<compile_context>
chip_gen: v5e
topology: v5e:2x2
jax: 0.10.0
libtpu: 0.0.40
codegen_flags: <defaults>
</compile_context>

<pallas_src>
import jax
import jax.numpy as jnp
from jax.experimental import pallas as pl
from jax.experimental.pallas import tpu as pltpu

_LANE = 128
_SUBLANE = 8


def _adjust_brightness_kernel(factor_ref, x_ref, o_ref):
    # factor_ref: SMEM (B,) float32 scalar-prefetch buffer.
    # x_ref / o_ref: VMEM (1, tile_rows, 128) lane-dense tile of flattened pixels.
    b = pl.program_id(0)
    f = factor_ref[b].astype(x_ref.dtype)  # keep sub-32-bit dtypes packed on the VPU
    o_ref[...] = jnp.clip(x_ref[...] * f, 0.0, 1.0)


def adjust_brightness(image: jax.Array, brightness_factor,
                      *, target_tile_bytes: int = 2 * 1024 * 1024) -> jax.Array:
    """Pallas TPU implementation of AdjustBrightness.forward.

    image: (B, C, H, W) floating-point array (NCHW), values expected in [0, 1].
    brightness_factor: python float / 0-d array (shared) or (B,) array.
    """
    if image.ndim != 4:
        raise ValueError(f"expected NCHW image, got shape {image.shape}")
    if not jnp.issubdtype(image.dtype, jnp.floating):
        # TODO(synk): integer ([0, 255]) images would need an explicit scale +
        # round + cast path; the module's clamp-to-[0,1] semantics assume floats.
        raise ValueError("adjust_brightness expects a floating-point image in [0, 1]")

    B, C, H, W = image.shape
    P = C * H * W

    factor = jnp.asarray(brightness_factor, dtype=jnp.float32)
    if factor.ndim == 0:
        factor = jnp.broadcast_to(factor, (B,))
    elif factor.shape != (B,):
        raise ValueError(
            f"brightness_factor must be scalar or shape ({B},), got {factor.shape}")

    # ---- lane-dense view: fold the C*H*W pixels onto (rows, 128) -------------
    itemsize = jnp.dtype(image.dtype).itemsize
    rows = pl.cdiv(P, _LANE)

    # Tile rows so one block is ~target_tile_bytes (multiple of 8 sublanes).
    max_rows_per_tile = max(
        _SUBLANE, (target_tile_bytes // (itemsize * _LANE)) // _SUBLANE * _SUBLANE)
    rows_pad = ((rows + _SUBLANE - 1) // _SUBLANE) * _SUBLANE
    tile_rows = min(max_rows_per_tile, rows_pad)
    rows_pad = ((rows_pad + tile_rows - 1) // tile_rows) * tile_rows
    padded = rows_pad * _LANE

    flat = image.reshape(B, P)
    if padded != P:
        flat = jnp.pad(flat, ((0, 0), (0, padded - P)))
    x3 = flat.reshape(B, rows_pad, _LANE)

    grid = (B, rows_pad // tile_rows)

    grid_spec = pltpu.PrefetchScalarGridSpec(
        num_scalar_prefetch=1,
        grid=grid,
        in_specs=[
            pl.BlockSpec((1, tile_rows, _LANE), lambda b, t, fac: (b, t, 0)),
        ],
        out_specs=pl.BlockSpec((1, tile_rows, _LANE), lambda b, t, fac: (b, t, 0)),
    )

    out3 = pl.pallas_call(
        _adjust_brightness_kernel,
        out_shape=jax.ShapeDtypeStruct((B, rows_pad, _LANE), image.dtype),
        grid_spec=grid_spec,
        compiler_params=pltpu.CompilerParams(
            dimension_semantics=("parallel", "parallel"),
            vmem_limit_bytes=32 * 1024 * 1024,
        ),
    )(factor, x3)

    return out3.reshape(B, padded)[:, :P].reshape(B, C, H, W)


if __name__ == "__main__":
    key = jax.random.PRNGKey(0)
    B, C, H, W = 2, 4, 16, 16

    # Deterministic example input in [0, 1], NCHW.
    x = jax.random.uniform(key, (B, C, H, W), dtype=jnp.float32)

    # Case 1: scalar brightness factor.
    y_scalar = jax.block_until_ready(adjust_brightness(x, 1.5))

    # Case 2: per-batch brightness factors (like torch.ones(2) in the docstring).
    per_batch = jnp.array([0.5, 2.0], dtype=jnp.float32)
    y_batch = jax.block_until_ready(adjust_brightness(x, per_batch))

    # Case 3: non-128-multiple pixel count exercises the padding path.
    x_odd = jax.random.uniform(jax.random.PRNGKey(1), (2, 3, 5, 7), dtype=jnp.float32)
    y_odd = jax.block_until_ready(adjust_brightness(x_odd, per_batch))

    # Reference checks in plain JAX.
    ref_scalar = jnp.clip(x * 1.5, 0.0, 1.0)
    ref_batch = jnp.clip(x * per_batch.reshape(B, 1, 1, 1), 0.0, 1.0)
    ref_odd = jnp.clip(x_odd * per_batch.reshape(2, 1, 1, 1), 0.0, 1.0)

    assert y_scalar.shape == (B, C, H, W)
    assert y_batch.shape == (B, C, H, W)
    assert y_odd.shape == x_odd.shape
    assert jnp.allclose(y_scalar, ref_scalar, atol=1e-6)
    assert jnp.allclose(y_batch, ref_batch, atol=1e-6)
    assert jnp.allclose(y_odd, ref_odd, atol=1e-6)

    print("KERNEL_OK")
</pallas_src>

<mosaic_0001>
module attributes {stable_mosaic.version = 11 : i64} {
  func.func @_adjust_brightness_kernel(%arg0: i32, %arg1: i32, %arg2: memref<2xf32, #tpu.memory_space<smem>>, %arg3: memref<1x8x128xf32, #tpu.memory_space<vmem>>, %arg4: memref<1x8x128xf32, #tpu.memory_space<vmem>>) attributes {dimension_semantics = [#tpu.dimension_semantics<parallel>, #tpu.dimension_semantics<parallel>], iteration_bounds = array<i64: 2, 1>, scalar_prefetch = 1 : i64, scratch_operands = 0 : i64, tpu.core_type = #tpu.core_type<tc>, window_params = [{transform_indices = @transform_0, window_bounds = array<i64: 1, 8, 128>}, {transform_indices = @transform_1, window_bounds = array<i64: 1, 8, 128>}]} {
    %0 = arith.index_cast %arg0 : i32 to index
    %1 = memref.load %arg2[%0] : memref<2xf32, #tpu.memory_space<smem>>
    %c0 = arith.constant 0 : index
    %c0_0 = arith.constant 0 : index
    %c0_1 = arith.constant 0 : index
    %2 = vector.load %arg3[%c0, %c0_0, %c0_1] : memref<1x8x128xf32, #tpu.memory_space<vmem>>, vector<1x8x128xf32>
    %3 = vector.broadcast %1 : f32 to vector<1x8x128xf32>
    %4 = arith.mulf %2, %3 : vector<1x8x128xf32>
    %cst = arith.constant 0.000000e+00 : f32
    %cst_2 = arith.constant 1.000000e+00 : f32
    %5 = vector.broadcast %cst : f32 to vector<1x8x128xf32>
    %6 = arith.maximumf %5, %4 : vector<1x8x128xf32>
    %7 = vector.broadcast %cst_2 : f32 to vector<1x8x128xf32>
    %8 = arith.minimumf %7, %6 : vector<1x8x128xf32>
    %c0_3 = arith.constant 0 : index
    %c0_4 = arith.constant 0 : index
    %c0_5 = arith.constant 0 : index
    %9 = vector.load %arg4[%c0_3, %c0_4, %c0_5] : memref<1x8x128xf32, #tpu.memory_space<vmem>>, vector<1x8x128xf32>
    tpu.vector_store %arg4[%c0_3, %c0_4, %c0_5], %8 {strides = array<i32>} : memref<1x8x128xf32, #tpu.memory_space<vmem>>, vector<1x8x128xf32>,
    return
  }
  func.func @transform_0(%arg0: i32, %arg1: i32, %arg2: memref<2xf32, #tpu.memory_space<smem>>) -> (i32, i32, i32) {
    %c0_i32 = arith.constant 0 : i32
    %c0_i32_0 = arith.constant 0 : i32
    return %arg0, %arg1, %c0_i32 : i32, i32, i32
  }
  func.func @transform_1(%arg0: i32, %arg1: i32, %arg2: memref<2xf32, #tpu.memory_space<smem>>) -> (i32, i32, i32) {
    %c0_i32 = arith.constant 0 : i32
    %c0_i32_0 = arith.constant 0 : i32
    return %arg0, %arg1, %c0_i32 : i32, i32, i32
  }
}

</mosaic_0001>

<bundles_post_ra>
// kernel: tpu_custom_call.1
= control target key start
LH: loop header
LB: loop body
LE: loop exit
PB: predicated region body
PF: predicated region fallthrough
CT: control target
= control target key end

     0   :  { %s468_s12 = smov [#allocation3]   ;;  %s608_s0 = inlined_call_operand.hbm [shape: f32[2], index: 0, kind: input, shape index: {}]   ;;  %s609_s1 = inlined_call_operand.hbm [shape: f32[2,8,128], index: 1, kind: input, shape index: {}]   ;;  %s610_s2 = inlined_call_operand.hbm [shape: f32[2,8,128], index: 2, kind: output, shape index: {}]  }
   0x1   :  { %s8_s11 = sshll.u32 %s608_s0, 4  ;;  %s9_s11 = int_to_ptr.hbm [resolvable:$true] %s8_s11 }
   0x2   :  { %11 = dma.hbm_to_smem %s9_s11, 16, %s468_s12, [#allocation2] }
   0x3   :  { %434 = dma.done.wait [#allocation2], 16 }
   0x4   :  { %435 = vsyncadd [#allocation2], 4294967280 }
   0x5   :  { %14 = sfence }
   0x6   :  { %15 = vsyncpa [#allocation5], 0 }
   0x7   :  { %17 = vsyncpa [#allocation5 + $0x1], 0 }
   0x8   :  { %18 = vsyncpa [#allocation6], 0 }
   0x9   :  { %20 = vsyncpa [#allocation6 + $0x1], 0  ;;  %s487_s13 = smov 0   ;;  %s489_s14 = smov 0  }
   0xa   :  { %s491_s15 = smov 0   ;;  %s493_s16 = smov 0  }
   0xb   :  { %s495_s17 = smov 0   ;;  %s497_s0 = smov 0  }
   0xc LB: > { %s264_s18 = sadd.s32 4294967295, %s466_s0   ;;  %s265_s19 = sadd.s32 4294967294, %s466_s0   ;;  %s466_s0 = sphi %s497_s0, %s26_s0   ;;  %s462_s17 = sphi %s495_s17, %s619_s17   ;;  %s458_s16 = sphi %s493_s16, %s618_s16   ;;  %s454_s15 = sphi %s491_s15, %s617_s15   ;;  %s450_s14 = sphi %s489_s14, %s616_s14   ;;  %s446_s13 = sphi %s487_s13, %s615_s13  }
   0xd   : > { %s38_s20 = sadd.s32 1, %s462_s17  ;;  %s47_s21 = sadd.s32 1, %s454_s15 }
   0xe   : > { %p40_p0 = scmp.ge.s32.totalorder %s38_s20, 2  ;;  %p54_p1 = scmp.ne.s32.totalorder %s454_s15, %s450_s14 }
   0xf   : > { %p55_p2 = scmp.eq.s32.totalorder %s466_s0, 0  ;;  %p60_p3 = scmp.ne.s32.totalorder %s450_s14, %s446_s13 }
  0x10   : > { %s621_s20 = smov (%p40_p0, %s38_s20), 0  ;;  %p61_p5 = scmp.eq.s32.totalorder %s264_s18, 0 }
  0x11   : > { %p528_p4 = por %p55_p2, %p54_p1  ;;  %s42_s23 = ssub.s32 %s462_s17, %s621_s20 }
  0x12   : > { %p86_p6 = scmp.eq.s32.totalorder %s264_s18, 1  ;;  %p45_p7 = scmp.eq.s32.totalorder %s42_s23, 0 }
  0x13   : > { %p534_p8 = por %p61_p5, %p60_p3  ;;  %p92_p10 = scmp.eq.s32.totalorder %s265_s19, 1 }
  0x14   : > { %p538_p9 = por %p86_p6, %p54_p1  ;;  %p267_p12 = scmp.ge.s32.totalorder %s466_s0, 2 }
  0x15   : > { %s543_s26 = scalar_select %p45_p7, %s454_s15, %s47_s21  }
  0x16   : > { %p545_p11 = por %p92_p10, %p60_p3  ;;  %p289_p13 = scmp.lt.s32.totalorder %s466_s0, 2 }
  0x17   : > { %s112_s28 = sand.u32 1, %s454_s15   ;;  %s269_s30 = sshll.u32 %s462_s17, 3 }
  0x18   : > { %s268_s29 = sshll.u32 %s112_s28, 3  ;;  %s121_s5 = scalar_lea.hbm %s609_s1, %s269_s30 }
  0x19   : > { %s116_s6 = scalar_lea.vmem [#allocation4], %s268_s29  ;;  %s123_s8 = sshll.u32 %s121_s5, 4  ;;  %s124_s8 = int_to_ptr.hbm [resolvable:$true] %s123_s8 }
  0x1a   : > { %s125_s7 = sshll.u32 %s116_s6, 4  ;;  %p282_p0 = pnand %p289_p13, %p528_p4  ;;  %s126_s7 = int_to_ptr.vmem [resolvable:$true] %s125_s7 }
  0x1b   : > { %p270_p1 = scmp.ge.s32.totalorder %s466_s0, 1  ;;  %p130_p2 = scmp.lt.s32.totalorder %s466_s0, 3 }
  0x1c   : > { %s113_s9 = scalar_lea.sflag [#allocation5], %s112_s28 }
  0x1d   : > { %284 = dma.hbm_to_vmem [thread:$0]  (!%p282_p0), %s124_s8, 128, %s126_s7, %s113_s9  }
  0x1e   : > { %p131_p3 = pnand %p270_p1, %p130_p2 }
  0x1f   : > { %s561_s10 = sand.u32 (!%p131_p3), 1, %s450_s14  }
  0x20   : > { %134 = sbr.rel (%p131_p3) target bundleno = 54 (0x36), region = 24  ;;  %s271_s11 = sshll.u32 (!%p131_p3), %s561_s10, 3 }
  0x21   : > { %s137_s12 = scalar_lea.sflag (!%p131_p3), [#allocation5], %s561_s10  ;;  %s140_s18 = scalar_lea.vmem (!%p131_p3), [#allocation4], %s271_s11 }
  0x25   : > { %437 = dma.done.wait (%p534_p8), %s137_s12, 128  }
  0x26   : > { %439 = vsyncadd (%p534_p8), %s137_s12, 4294967168  ;;  %s160_s19 = sld [smem:[#allocation3 + %s458_s16]]  ;;  %s274_s21 = sshll.u32 %s458_s16, 3  ;;  %v161_v1 = vld [vmem:[%s140_s18] sm:$0xff] }
  0x27   : > { %s179_s28 = scalar_lea.hbm %s610_s2, %s274_s21  ;;  %s159_s29 = scalar_lea.vmem [#allocation7], %s271_s11 }
  0x28   : > { %s181_s30 = sshll.u32 %s159_s29, 4  ;;  %s183_s3 = sshll.u32 %s179_s28, 4  ;;  %s182_s30 = int_to_ptr.vmem [resolvable:$true] %s181_s30  ;;  %s184_s3 = int_to_ptr.hbm [resolvable:$true] %s183_s3 }
  0x29   : > { %s168_s24 = scalar_lea.sflag [#allocation6], %s561_s10  ;;  %s396_s4 = sshra.s32 %s184_s3, 4  ;;  %s397_s4 = int_to_ptr.hbm [resolvable:$true] %s396_s4 }
  0x2a   : > { %s398_s16 = scalar_lea.hbm %s397_s4, 8  ;;  %s402_s7 = scalar_lea.hbm %s610_s2, 16 }
  0x2b   : > { %p399_p4 = scmp.ne.s32.totalorder %s397_s4, %s398_s16  ;;  %p403_p7 = scmp.lt.s32.totalorder %s397_s4, %s610_s2 }
  0x2c   : > { %v162_v0 = vstv %s160_s19  ;;  %p404_p8 = scmp.lt.s32.totalorder %s402_s7, %s398_s16 }
  0x2d   : > { %v163_v2 = vmul.f32 %v162_v0, %v161_v1  ;;  %p400_p5 = pnand %p399_p4, %p538_p9 }
  0x2e   : > { %p405_p10 = por %p404_p8, %p403_p7 }
  0x2f   : > { %v164_v3 = vmax.f32 %v163_v2, 0.0  ;;  %p401_p6 = pneg %p400_p5 }
  0x31   : > { %v165_v4 = vmin.f32 %v164_v3, 1.0  ;;  %p406_p13 = pnand %p405_p10, %p401_p6 }
  0x33   : > { %166 = vst [vmem:[%s159_s29] sm:$0xff] %v165_v4 }
  0x34   : > { %409 = shalt.err (!%p406_p13)
}
  0x35   : > { %279 = dma.vmem_to_hbm [thread:$0]  (%p538_p9), %s182_s30, 128, %s184_s3, %s168_s24  }
  0x36 PF: > { %s195_s10 = sand.u32 1, %s446_s13   ;;  %p286_p0 = pnand %p267_p12, %p545_p11 }
  0x37   : > { %s196_s11 = scalar_lea.sflag [#allocation6], %s195_s10 }
  0x38   : > { %p287_p1 = pneg %p286_p0 }
  0x3a   : > { %441 = dma.done.wait (%p287_p1), %s196_s11, 128  }
  0x3b   : > { %443 = vsyncadd (%p287_p1), %s196_s11, 4294967168  ;;  %s26_s0 = sadd.s32 1, %s466_s0   ;;  %s615_s13 = smov %s450_s14 }
  0x3c   : > { %p23_p2 = scmp.ge.s32.totalorder %s26_s0, 4   ;;  %s616_s14 = smov %s454_s15 }
  0x3d   : > { %s617_s15 = smov %s543_s26  ;;  %s618_s16 = smov %s462_s17 }
  0x3e   : > { %s619_s17 = smov %s621_s20  ;;  %25 = sbr.rel (!%p23_p2) target bundleno = 12 (0xc), region = 69 }
  0x43   :  { %202 = vsyncpa [#allocation5], 1 }
  0x44   :  { %204 = vsyncpa [#allocation5 + $0x1], 1 }
  0x45   :  { %205 = vsyncpa [#allocation6], 1 }
  0x46   :  { %207 = vsyncpa [#allocation6 + $0x1], 1 }

</bundles_post_ra>
